<compile_context>
chip_gen: v6e
topology: v6e:2x2x1
jax: 0.10.0
libtpu: 0.0.40
codegen_flags: <defaults>
</compile_context>

<pallas_src>
import jax
import jax.numpy as jnp
from jax import lax
from jax.experimental import pallas as pl
from jax.experimental.pallas import tpu as pltpu


_CHUNK_ROWS = 128  # in-kernel sub-chunk size (rows); keeps vreg liveness low


def _rope_kernel(pos_ref, inv_freq_ref, cos_ref, sin_ref):
    # pos_ref      : (t, 1)   f32 positions for this row tile (sublane axis)
    # inv_freq_ref : (1, dim) f32, full-width (= tile(inv_freq, 2)), resident
    # cos/sin_ref  : (t, dim) outputs, dim on the lane axis (lane-dense store)
    t = pos_ref.shape[0]
    inv_freq = inv_freq_ref[...]                      # hoisted, (1, dim)

    def do_chunk(r0, n):
        pos = pos_ref[pl.ds(r0, n), :]                # (n, 1)
        freqs = pos * inv_freq                        # (n, dim) VPU broadcast mul
        cos_ref[pl.ds(r0, n), :] = jnp.cos(freqs).astype(cos_ref.dtype)
        sin_ref[pl.ds(r0, n), :] = jnp.sin(freqs).astype(sin_ref.dtype)

    n_full = t // _CHUNK_ROWS
    rem = t % _CHUNK_ROWS

    if n_full > 0:
        def body(c, carry):
            r0 = pl.multiple_of(c * _CHUNK_ROWS, _CHUNK_ROWS)
            do_chunk(r0, _CHUNK_ROWS)
            return carry
        lax.fori_loop(0, n_full, body, 0, unroll=True)

    if rem > 0:  # static tail (tile smaller than / not a multiple of the chunk)
        do_chunk(n_full * _CHUNK_ROWS, rem)


def _pick_row_tile(rows):
    # Small problems: one grid step -> no per-step pipeline overhead.
    if rows <= 512:
        return rows
    # Large problems: biggest aligned tile that still leaves >= 2 grid steps
    # (DMA/compute overlap + v7x dual-TensorCore sharding of the parallel axis).
    for cand in (1024, 512, 256, 128, 64):
        if rows % cand == 0 and rows // cand >= 2:
            return cand
    # Awkward row counts: single block fallback; in-kernel chunking keeps the
    # vreg working set bounded even for a big block.
    return rows


def chameleon_rotary_embedding(x, position_ids, *, dim,
                               max_position_embeddings=2048,
                               base=10000.0, scaling_factor=1.0):
    """Pallas TPU implementation of ChameleonRotaryEmbedding.forward.

    x            : any array; only its dtype is used (output dtype), as in torch.
    position_ids : (B, S) integer (or float) positions.
    Returns (cos, sin), each of shape (B, S, dim) with dtype x.dtype.
    """
    # scaling_factor / max_position_embeddings are attributes only in the base
    # forward; they do not affect the computation.
    del max_position_embeddings, scaling_factor
    assert dim % 2 == 0
    b, s = position_ids.shape
    rows = b * s

    # Constant buffer (registered once in torch __init__) -> built outside the
    # kernel; duplicated to full width so the kernel never concatenates lanes.
    inv_freq = 1.0 / (base ** (jnp.arange(0, dim, 2, dtype=jnp.float32) / dim))
    inv_freq_full = jnp.concatenate([inv_freq, inv_freq]).reshape(1, dim)

    # Flatten (B, S) -> rows: positions sit on the sublane axis, dim on lanes.
    pos = position_ids.reshape(rows, 1).astype(jnp.float32)

    t = _pick_row_tile(rows)
    grid = (rows // t,)
    out_dtype = x.dtype

    cos, sin = pl.pallas_call(
        _rope_kernel,
        out_shape=(jax.ShapeDtypeStruct((rows, dim), out_dtype),
                   jax.ShapeDtypeStruct((rows, dim), out_dtype)),
        grid_spec=pltpu.PrefetchScalarGridSpec(
            num_scalar_prefetch=0,
            grid=grid,
            in_specs=[
                pl.BlockSpec((t, 1), lambda i: (i, 0)),      # positions tile
                pl.BlockSpec((1, dim), lambda i: (0, 0)),    # inv_freq (resident)
            ],
            out_specs=[
                pl.BlockSpec((t, dim), lambda i: (i, 0)),    # cos
                pl.BlockSpec((t, dim), lambda i: (i, 0)),    # sin
            ],
        ),
        compiler_params=pltpu.CompilerParams(
            dimension_semantics=("parallel",)),
    )(pos, inv_freq_full)

    return cos.reshape(b, s, dim), sin.reshape(b, s, dim)


def reference_rotary_embedding(x, position_ids, *, dim, base=10000.0):
    """Pure-JAX reference matching the PyTorch forward exactly."""
    inv_freq = 1.0 / (base ** (jnp.arange(0, dim, 2, dtype=jnp.float32) / dim))
    freqs = position_ids.astype(jnp.float32)[..., None] * inv_freq[None, None, :]
    emb = jnp.concatenate([freqs, freqs], axis=-1)
    return jnp.cos(emb).astype(x.dtype), jnp.sin(emb).astype(x.dtype)


def _check(b, s, hidden, dim, key):
    kx, kp = jax.random.split(key)
    x = jax.random.normal(kx, (b, s, hidden), jnp.float32)   # only dtype is used
    position_ids = jax.random.randint(kp, (b, s), 0, 256, dtype=jnp.int32)

    cos, sin = chameleon_rotary_embedding(x, position_ids, dim=dim)
    cos, sin = jax.block_until_ready((cos, sin))

    cos_ref, sin_ref = reference_rotary_embedding(x, position_ids, dim=dim)
    assert cos.shape == (b, s, dim) and sin.shape == (b, s, dim)
    assert jnp.allclose(cos, cos_ref, atol=1e-5, rtol=1e-5), (
        f"cos max abs err {jnp.max(jnp.abs(cos - cos_ref))}")
    assert jnp.allclose(sin, sin_ref, atol=1e-5, rtol=1e-5), (
        f"sin max abs err {jnp.max(jnp.abs(sin - sin_ref))}")


if __name__ == "__main__":
    key = jax.random.PRNGKey(0)
    k1, k2 = jax.random.split(key)
    # Production-like rotary dim (Chameleon head_dim = 128): lane-dense stores.
    _check(b=2, s=16, hidden=32, dim=128, key=k1)
    # Smaller rotary dim still supported (correctness path, masked stores).
    _check(b=1, s=8, hidden=32, dim=64, key=k2)
    print("KERNEL_OK")
</pallas_src>

<mosaic_0001>
module attributes {stable_mosaic.version = 11 : i64} {
  func.func @_rope_kernel(%arg0: i32, %arg1: memref<32x1xf32, #tpu.memory_space<vmem>>, %arg2: memref<1x128xf32, #tpu.memory_space<vmem>>, %arg3: memref<32x128xf32, #tpu.memory_space<vmem>>, %arg4: memref<32x128xf32, #tpu.memory_space<vmem>>) attributes {dimension_semantics = [#tpu.dimension_semantics<parallel>], iteration_bounds = array<i64: 1>, scalar_prefetch = 0 : i64, scratch_operands = 0 : i64, tpu.core_type = #tpu.core_type<tc>, window_params = [{transform_indices = @transform_0, window_bounds = array<i64: 32, 1>}, {pipeline_mode = #tpu.pipeline_mode<synchronous>, transform_indices = @transform_1, window_bounds = array<i64: 1, 128>}, {transform_indices = @transform_2, window_bounds = array<i64: 32, 128>}, {transform_indices = @transform_3, window_bounds = array<i64: 32, 128>}]} {
    %c0 = arith.constant 0 : index
    %c0_0 = arith.constant 0 : index
    %0 = vector.load %arg2[%c0, %c0_0] : memref<1x128xf32, #tpu.memory_space<vmem>>, vector<1x128xf32>
    %c0_1 = arith.constant 0 : index
    %c0_2 = arith.constant 0 : index
    %1 = vector.load %arg1[%c0_1, %c0_2] : memref<32x1xf32, #tpu.memory_space<vmem>>, vector<32x1xf32>
    %2 = vector.broadcast %1 : vector<32x1xf32> to vector<32x128xf32>
    %3 = vector.broadcast %0 : vector<1x128xf32> to vector<32x128xf32>
    %4 = arith.mulf %2, %3 : vector<32x128xf32>
    %5 = math.cos %4 : vector<32x128xf32>
    %c0_3 = arith.constant 0 : index
    %c0_4 = arith.constant 0 : index
    %6 = vector.load %arg3[%c0_3, %c0_4] : memref<32x128xf32, #tpu.memory_space<vmem>>, vector<32x128xf32>
    tpu.vector_store %arg3[%c0_3, %c0_4], %5 {strides = array<i32>} : memref<32x128xf32, #tpu.memory_space<vmem>>, vector<32x128xf32>,
    %7 = math.sin %4 : vector<32x128xf32>
    %c0_5 = arith.constant 0 : index
    %c0_6 = arith.constant 0 : index
    %8 = vector.load %arg4[%c0_5, %c0_6] : memref<32x128xf32, #tpu.memory_space<vmem>>, vector<32x128xf32>
    tpu.vector_store %arg4[%c0_5, %c0_6], %7 {strides = array<i32>} : memref<32x128xf32, #tpu.memory_space<vmem>>, vector<32x128xf32>,
    return
  }
  func.func @transform_0(%arg0: i32) -> (i32, i32) {
    %c0_i32 = arith.constant 0 : i32
    %c0_i32_0 = arith.constant 0 : i32
    return %arg0, %c0_i32 : i32, i32
  }
  func.func @transform_1(%arg0: i32) -> (i32, i32) {
    %c0_i32 = arith.constant 0 : i32
    %c0_i32_0 = arith.constant 0 : i32
    %c0_i32_1 = arith.constant 0 : i32
    return %c0_i32, %c0_i32_0 : i32, i32
  }
  func.func @transform_2(%arg0: i32) -> (i32, i32) {
    %c0_i32 = arith.constant 0 : i32
    %c0_i32_0 = arith.constant 0 : i32
    return %arg0, %c0_i32 : i32, i32
  }
  func.func @transform_3(%arg0: i32) -> (i32, i32) {
    %c0_i32 = arith.constant 0 : i32
    %c0_i32_0 = arith.constant 0 : i32
    return %arg0, %c0_i32 : i32, i32
  }
}

</mosaic_0001>

<bundles_post_ra>
// kernel: tpu_custom_call.1
= control target key start
LH: loop header
LB: loop body
LE: loop exit
PB: predicated region body
PF: predicated region fallthrough
CT: control target
= control target key end

     0   :  { %9 = vsyncpa [#allocation3], 0  ;;  %v1040_v2 = vmov 0   ;;  %s1387_s0 = inlined_call_operand.vmem [shape: f32[32,1], index: 0, kind: input, shape index: {}]   ;;  %s1388_s1 = inlined_call_operand.vmem [shape: f32[1,128], index: 1, kind: input, shape index: {}]   ;;  %s1389_s2 = inlined_call_operand.hbm [shape: f32[32,128], index: 2, kind: output, shape index: {0}]   ;;  %s1390_s3 = inlined_call_operand.hbm [shape: f32[32,128], index: 3, kind: output, shape index: {1}]  }
   0x1   :  { %v18_v0 = vld [vmem:[%s1387_s0 + $0x10] sm:$0xff]  ;;  %v16_v1 = vld [vmem:[%s1387_s0] sm:$0xff]  ;;  %979 = vset.pattern.permute.xlu1 %v1040_v2  ;;  %978 = vset.pattern.permute.xlu0 %v1040_v2  ;;  %v19_v3 = vld [vmem:[%s1387_s0 + $0x18] sm:$0xff] }
   0x2   :  { %32 = vperm.xlu1 %979, %v18_v0   ;;  %22 = vperm.xlu0 %978, %v16_v1   ;;  %v17_v4 = vld [vmem:[%s1387_s0 + $0x8] sm:$0xff] }
   0x3   :  { %10 = vsyncpa [#allocation5], 0  ;;  %v918_v5 = vld [vmem:[%s1388_s1] ss:$0 sm:$0xff]  ;;  %v1041_v41 = vmov 683565275  }
   0x4   :  { %v1042_v45 = vmov 2475754826   ;;  %v1043_v47 = vmov 2131351028   ;;  %v1044_v49 = vmov 2102212464  }
   0x5   :  { %v1045_v51 = vmov 920167782   ;;  %v1046_v58 = vmov 1326507024   ;;  %s1047_s0 = smov [#allocation2]   ;;  %s1048_s22 = smov [#allocation4]  }
   0x6   :  { %37 = vperm.xlu1 %979, %v19_v3   ;;  %27 = vperm.xlu0 %978, %v17_v4   ;;  %s891_s1 = sshll.u32 %s1047_s0, 4  ;;  %s903_s23 = sshll.u32 %s1048_s22, 4  ;;  %s892_s1 = int_to_ptr.vmem [resolvable:$true] %s891_s1  ;;  %s904_s23 = int_to_ptr.vmem [resolvable:$true] %s903_s23 }
   0x7   :  { %s996_s24 = scalar_lea.vmem %s892_s1, 512  ;;  %p1001_p1 = scmp.lt.s32.totalorder %s892_s1, %s892_s1 }
   0x8   :  { %p997_p0 = scmp.ne.s32.totalorder %s892_s1, %s996_s24  ;;  %p1002_p2 = scmp.lt.s32.totalorder %s996_s24, %s996_s24 }
   0xa   :  { %p1003_p3 = por %p1002_p2, %p1001_p1 }
   0xc   :  { %p1004_p4 = pnand %p1003_p3, %p997_p0 }
  0x7d   :  { %v33_v6 = vpop.permute.xlu1 %32  ;;  %v23_v7 = vpop.permute.xlu0 %22 }
  0x7e   :  { %v1086_v8 = vmul.f32 %v918_v5, %v33_v6  ;;  %v1088_v9 = vmul.f32 %v918_v5, %v23_v7 }
  0x80   :  { %v256_v10 = vand.u32 2147483647, %v1086_v8  ;;  %v259_v11 = vand.u32 2139095040, %v1086_v8  ;;  %v50_v12 = vand.u32 2147483647, %v1088_v9  ;;  %v53_v13 = vand.u32 2139095040, %v1088_v9 }
  0x81   :  { %v38_v14 = vpop.permute.xlu1 %37  ;;  %v28_v29 = vpop.permute.xlu0 %27  ;;  %vm258_vm13 = vcmp.lt.s32.totalorder %v1086_v8, 0 }
  0x82   :  { %v260_v15 = vshrl.u32 %v259_v11, 23  ;;  %v263_v16 = vand.u32 8388607, %v256_v10  ;;  %v1096_v17 = vmul.f32 %v918_v5, %v38_v14  ;;  %v54_v18 = vshrl.u32 %v53_v13, 23 }
  0x83   :  { %v57_v19 = vand.u32 8388607, %v50_v12  ;;  %v1102_v35 = vmul.f32 %v918_v5, %v28_v29 }
  0x84   :  { %v927_v20 = vadd.s32 4294967169, %v260_v15  ;;  %v919_v21 = vadd.s32 4294967169, %v54_v18  ;;  %v362_v22 = vand.u32 2139095040, %v1096_v17  ;;  %v264_v23 = vor.u32 8388608, %v263_v16 }
  0x85   :  { %v58_v25 = vor.u32 8388608, %v57_v19  ;;  %v359_v27 = vand.u32 2147483647, %v1096_v17 }
  0x86   :  { %v266_v24 = vadd.s32 1, %v927_v20  ;;  %v60_v26 = vadd.s32 1, %v919_v21  ;;  %v363_v28 = vshrl.u32 %v362_v22, 23  ;;  %v1104_v36 = vshll.u32 %v264_v23, 8 }
  0x87   :  { %v1108_v38 = vshll.u32 %v58_v25, 8  ;;  %v1112_v39 = vand.u32 8388607, %v359_v27 }
  0x88   :  { %vm267_vm0 = vcmp.gt.s32.totalorder %v266_v24, 0  ;;  %vm61_vm1 = vcmp.gt.s32.totalorder %v60_v26, 0  ;;  %v931_v31 = vadd.s32 4294967169, %v363_v28 }
  0x89   :  { %v268_v30 = vsel %vm267_vm0, %v266_v24, 0  ;;  %v62_v34 = vsel %vm61_vm1, %v60_v26, 0 }
  0x8a   :  { %v269_v32 = vshrl.u32 %v268_v30, 5  ;;  %v270_v33 = vand.u32 31, %v268_v30  ;;  %v1106_v37 = vshrl.u32 %v62_v34, 5  ;;  %v64_v43 = vand.u32 31, %v62_v34 }
  0x8b   :  { %v1115_v44 = vadd.s32 1, %v931_v31 }
  0x8c   :  { %v271_v40 = vsub.s32 32, %v270_v33  ;;  %v273_v42 = vshll.u32 %v1041_v41, %v270_v33  ;;  %v276_v46 = vshll.u32 %v1042_v45, %v270_v33  ;;  %v279_v48 = vshll.u32 %v1043_v47, %v270_v33 }
  0x8d   :  { %v282_v50 = vshll.u32 %v1044_v49, %v270_v33  ;;  %v285_v52 = vshll.u32 %v1045_v51, %v270_v33  ;;  %vm288_vm2 = vcmp.lt.s32.totalorder %v269_v32, 1  ;;  %vm289_vm3 = vcmp.lt.s32.totalorder %v269_v32, 2 }
  0x8e   :  { %v274_v53 = vshrl.u32 %v1042_v45, %v271_v40  ;;  %v277_v54 = vshrl.u32 %v1043_v47, %v271_v40  ;;  %v280_v55 = vshrl.u32 %v1044_v49, %v271_v40  ;;  %v272_v56 = vshrl.u32 %v1041_v41, %v271_v40 }
  0x8f   :  { %v283_v57 = vshrl.u32 %v1045_v51, %v271_v40  ;;  %v286_v59 = vshrl.u32 %v1046_v58, %v271_v40  ;;  %v65_v63 = vsub.s32 32, %v64_v43  ;;  %vm290_vm4 = vcmp.lt.s32.totalorder %v269_v32, 3 }
  0x90   :  { %v275_v60 = vor.u32 %v274_v53, %v273_v42  ;;  %v278_v61 = vor.u32 %v277_v54, %v276_v46  ;;  %v281_v62 = vor.u32 %v280_v55, %v279_v48  ;;  %vm291_vm5 = vcmp.lt.s32.totalorder %v269_v32, 4 }
  0x91   :  { %v284_v0 = vor.u32 %v283_v57, %v282_v50  ;;  %v287_v1 = vor.u32 %v286_v59, %v285_v52  ;;  %v67_v13 = vshll.u32 %v1041_v41, %v64_v43  ;;  %v68_v16 = vshrl.u32 %v1042_v45, %v65_v63 }
  0x92   :  { %v292_v2 = vsel %vm288_vm2, %v272_v56, %v275_v60  ;;  %v293_v3 = vsel %vm291_vm5, %v281_v62, 2102212464  ;;  %v296_v4 = vsel %vm288_vm2, %v275_v60, %v278_v61  ;;  %v300_v5 = vsel %vm288_vm2, %v278_v61, %v281_v62 }
  0x93   :  { %v294_v6 = vsel %vm290_vm4, %v278_v61, %v293_v3  ;;  %v297_v7 = vsel %vm291_vm5, %v284_v0, 920167782  ;;  %v301_v11 = vsel %vm291_vm5, %v287_v1, 1326507024  ;;  %v70_v18 = vshll.u32 %v1042_v45, %v64_v43 }
  0x94   :  { %v298_v14 = vsel %vm290_vm4, %v281_v62, %v297_v7  ;;  %v302_v15 = vsel %vm290_vm4, %v284_v0, %v301_v11  ;;  %v295_v19 = vsel %vm289_vm3, %v292_v2, %v294_v6  ;;  %v71_v22 = vshrl.u32 %v1043_v47, %v65_v63 }
  0x95   :  { %v299_v20 = vsel %vm289_vm3, %v296_v4, %v298_v14  ;;  %v303_v21 = vsel %vm289_vm3, %v300_v5, %v302_v15  ;;  %v69_v28 = vor.u32 %v68_v16, %v67_v13  ;;  %v73_v30 = vshll.u32 %v1043_v47, %v64_v43 }
  0x96   :  { %v1138_v23 = vmul.u32.u64.low %v1104_v36, %v303_v21  ;;  %v1139_v24 = vmul.u32.u64.high %v1104_v36, %v303_v21, %v1138_v23  ;;  %v1142_v25 = vmul.u32.u64.low %v1104_v36, %v299_v20  ;;  %v1143_v26 = vmul.u32.u64.high %v1104_v36, %v299_v20, %v1142_v25 }
  0x97   :  { %v72_v29 = vor.u32 %v71_v22, %v70_v18  ;;  %v74_v31 = vshrl.u32 %v1044_v49, %v65_v63  ;;  %v66_v32 = vshrl.u32 %v1041_v41, %v65_v63  ;;  %v76_v33 = vshll.u32 %v1044_v49, %v64_v43 }
  0x98   :  { %v77_v34 = vshrl.u32 %v1045_v51, %v65_v63  ;;  %v80_v40 = vshrl.u32 %v1046_v58, %v65_v63  ;;  %v311_v42 = vmul.u32 %v1104_v36, %v295_v19  ;;  %v79_v48 = vshll.u32 %v1045_v51, %v64_v43 }
  0x99   :  { %v75_v46 = vor.u32 %v74_v31, %v73_v30  ;;  %vm82_vm6 = vcmp.lt.s32.totalorder %v1106_v37, 1  ;;  %vm313_vm7 = vc.u32 %v1139_v24, %v1142_v25  ;;  %v314_v50 = vadd.s32 1, %v1143_v26 }
  0x9a   :  { %v78_v52 = vor.u32 %v77_v34, %v76_v33  ;;  %vm83_vm8 = vcmp.lt.s32.totalorder %v1106_v37, 2  ;;  %v81_v53 = vor.u32 %v80_v40, %v79_v48  ;;  %vm84_vm9 = vcmp.lt.s32.totalorder %v1106_v37, 3 }
  0x9b   :  { %vm85_vm10 = vcmp.lt.s32.totalorder %v1106_v37, 4  ;;  %v90_v54 = vsel %vm82_vm6, %v69_v28, %v72_v29  ;;  %v315_v36 = vsel %vm313_vm7, %v314_v50, %v1143_v26  ;;  %v94_v56 = vsel %vm82_vm6, %v72_v29, %v75_v46 }
  0x9c   :  { %v87_v55 = vsel %vm85_vm10, %v75_v46, 2102212464  ;;  %v91_v43 = vsel %vm85_vm10, %v78_v52, 920167782  ;;  %v316_v57 = vadd.s32 %v315_v36, %v311_v42  ;;  %v86_v59 = vsel %vm82_vm6, %v66_v32, %v69_v28 }
  0x9d   :  { %v92_v60 = vsel %vm84_vm9, %v75_v46, %v91_v43  ;;  %v95_v61 = vsel %vm85_vm10, %v81_v53, 1326507024  ;;  %v88_v62 = vsel %vm84_vm9, %v72_v29, %v87_v55  ;;  %vm370_vm11 = vcmp.gt.s32.totalorder %v1115_v44, 0 }
  0x9e   :  { %v93_v63 = vsel %vm83_vm8, %v90_v54, %v92_v60  ;;  %v96_v0 = vsel %vm84_vm9, %v78_v52, %v95_v61  ;;  %v317_v1 = vadd.s32 536870912, %v316_v57  ;;  %v371_v7 = vsel %vm370_vm11, %v1115_v44, 0 }
  0x9f   :  { %v97_v2 = vsel %vm83_vm8, %v94_v56, %v96_v0  ;;  %v1168_v3 = vmul.u32.u64.low %v1108_v38, %v93_v63  ;;  %v1169_v4 = vmul.u32.u64.high %v1108_v38, %v93_v63, %v1168_v3  ;;  %v89_v13 = vsel %vm83_vm8, %v86_v59, %v88_v62 }
  0xa0   :  { %v1173_v5 = vmul.u32.u64.low %v1108_v38, %v97_v2  ;;  %v1174_v6 = vmul.u32.u64.high %v1108_v38, %v97_v2, %v1173_v5  ;;  %v318_v11 = vshrl.u32 %v317_v1, 30  ;;  %v373_v14 = vand.u32 31, %v371_v7 }
  0xa1   :  { %v153_v15 = vand.u32 2147483647, %v1102_v35  ;;  %v108_v18 = vadd.s32 1, %v1169_v4  ;;  %v367_v19 = vor.u32 8388608, %v1112_v39  ;;  %v105_v21 = vmul.u32 %v1108_v38, %v89_v13 }
  0xa2   :  { %v319_v16 = vshll.u32 %v318_v11, 30  ;;  %v374_v20 = vsub.s32 32, %v373_v14  ;;  %vm107_vm12 = vc.u32 %v1174_v6, %v1168_v3  ;;  %v156_v26 = vand.u32 2139095040, %v1102_v35 }
  0xa3   :  { %v109_v44 = vsel %vm107_vm12, %v108_v18, %v1169_v4  ;;  %v1192_v28 = vand.u32 8388607, %v153_v15  ;;  %v1196_v39 = vshrl.u32 %v371_v7, 5  ;;  %v1199_v30 = vshll.u32 %v367_v19, 8 }
  0xa4   :  { %v1185_v22 = vsub.s32 %v316_v57, %v319_v16  ;;  %v110_v37 = vadd.s32 %v109_v44, %v105_v21  ;;  %v377_v23 = vshrl.u32 %v1042_v45, %v374_v20  ;;  %v380_v29 = vshrl.u32 %v1043_v47, %v374_v20 }
  0xa5   :  { %v376_v32 = vshll.u32 %v1041_v41, %v373_v14  ;;  %v379_v33 = vshll.u32 %v1042_v45, %v373_v14  ;;  %v383_v34 = vshrl.u32 %v1044_v49, %v374_v20  ;;  %v382_v42 = vshll.u32 %v1043_v47, %v373_v14 }
  0xa6   :  { %v322_v38 = vsub.s32 0, %v1185_v22  ;;  %v111_v31 = vadd.s32 536870912, %v110_v37  ;;  %v385_v46 = vshll.u32 %v1044_v49, %v373_v14  ;;  %v386_v48 = vshrl.u32 %v1045_v51, %v374_v20 }
  0xa7   :  { %v378_v52 = vor.u32 %v377_v23, %v376_v32  ;;  %v389_v53 = vshrl.u32 %v1046_v58, %v374_v20  ;;  %v157_v54 = vshrl.u32 %v156_v26, 23  ;;  %v381_v55 = vor.u32 %v380_v29, %v379_v33 }
  0xa8   :  { %v928_v40 = vmin.u32 %v322_v38, %v1185_v22  ;;  %v1208_v50 = vshrl.u32 %v111_v31, 30  ;;  %v384_v43 = vor.u32 %v383_v34, %v382_v42  ;;  %v387_v56 = vor.u32 %v386_v48, %v385_v46 }
  0xa9   :  { %v312_v57 = vadd.s32 %v1142_v25, %v1139_v24  ;;  %v342_v59 = vsub.s32 4, %v318_v11  ;;  %v388_v61 = vshll.u32 %v1045_v51, %v373_v14  ;;  %v375_v63 = vshrl.u32 %v1041_v41, %v374_v20 }
  0xaa   :  { %v324_v36 = vclz %v928_v40  ;;  %v113_v60 = vshll.u32 %v1208_v50, 30  ;;  %vm391_vm14 = vcmp.lt.s32.totalorder %v1196_v39, 1  ;;  %vm394_vm15 = vcmp.lt.s32.totalorder %v1196_v39, 4 }
  0xab   :  { %v390_v1 = vor.u32 %v389_v53, %v388_v61  ;;  %vm393_vm0 = vcmp.lt.s32.totalorder %v1196_v39, 3  ;;  %v400_v24 = vsel %vm394_vm15, %v387_v56, 920167782  ;;  %v396_v25 = vsel %vm394_vm15, %v384_v43, 2102212464 }
  0xac   :  { %v929_v62 = vadd.s32 4294967294, %v324_v36  ;;  %v1218_v0 = vsub.s32 %v110_v37, %v113_v60  ;;  %v399_v2 = vsel %vm391_vm14, %v378_v52, %v381_v55  ;;  %v401_v4 = vsel %vm393_vm0, %v384_v43, %v400_v24 }
  0xad   :  { %v343_v7 = vsel %vm258_vm13, %v342_v59, %v318_v11  ;;  %v923_v14 = vadd.s32 4294967169, %v157_v54  ;;  %vm392_vm2 = vcmp.lt.s32.totalorder %v1196_v39, 2  ;;  %v395_v19 = vsel %vm391_vm14, %v375_v63, %v378_v52 }
  0xae   :  { %vm930_vm1 = vcmp.lt.s32.totalorder %v929_v62, 0  ;;  %v116_v13 = vsub.s32 0, %v1218_v0  ;;  %v397_v21 = vsel %vm393_vm0, %v381_v55, %v396_v25  ;;  %v402_v44 = vsel %vm392_vm2, %v399_v2, %v401_v4 }
  0xaf   :  { %v327_v5 = vsel %vm930_vm1, 0, %v929_v62  ;;  %v403_v11 = vsel %vm391_vm14, %v381_v55, %v384_v43  ;;  %v404_v38 = vsel %vm394_vm15, %v390_v1, 1326507024  ;;  %vm1256_vm3 = vcmp.le.f32.partialorder %v256_v10, 0.7853982 }
  0xb0   :  { %v328_v16 = vsub.s32 32, %v327_v5  ;;  %v332_v18 = vsub.s32 4294967266, %v327_v5  ;;  %v920_v20 = vmin.u32 %v116_v13, %v1218_v0  ;;  %v329_v37 = vshll.u32 %v1185_v22, %v327_v5 }
  0xb1   :  { %v405_v31 = vsel %vm393_vm0, %v387_v56, %v404_v38  ;;  %v1248_v32 = vmul.u32.u64.low %v1199_v30, %v402_v44  ;;  %v1249_v33 = vmul.u32.u64.high %v1199_v30, %v402_v44, %v1248_v32  ;;  %v163_v22 = vadd.s32 1, %v923_v14 }
  0xb2   :  { %v330_v23 = vshrl.u32 %v312_v57, %v328_v16  ;;  %v333_v26 = vadd.s32 127, %v332_v18  ;;  %v118_v29 = vclz %v920_v20  ;;  %v406_v42 = vsel %vm392_vm2, %v403_v11, %v405_v31 }
  0xb3   :  { %v1261_v52 = vmul.u32.u64.low %v1199_v30, %v406_v42  ;;  %v1262_v53 = vmul.u32.u64.high %v1199_v30, %v406_v42, %v1261_v52  ;;  %v345_v36 = vsel %vm1256_vm3, 0, %v343_v7  ;;  %v161_v55 = vor.u32 8388608, %v1192_v28 }
  0xb4   :  { %v331_v34 = vor.u32 %v330_v23, %v329_v37  ;;  %v334_v40 = vshll.u32 %v333_v26, 23  ;;  %v921_v48 = vadd.s32 4294967294, %v118_v29  ;;  %vm164_vm4 = vcmp.gt.s32.totalorder %v163_v22, 0 }
  0xb5   :  { %v398_v43 = vsel %vm392_vm2, %v395_v19, %v397_v21  ;;  %v417_v10 = vadd.s32 1, %v1249_v33  ;;  %v165_v56 = vsel %vm164_vm4, %v163_v22, 0  ;;  %v1270_v62 = vand.u32 3, %v345_v36 }
  0xb6   :  { %v335_v54 = vor.u32 4788187, %v334_v40  ;;  %vm922_vm5 = vcmp.lt.s32.totalorder %v921_v48, 0  ;;  %v338_v59 = vcvt.s32.f32 %v331_v34  ;;  %v167_v61 = vand.u32 31, %v165_v56 }
  0xb7   :  { %v121_v60 = vsel %vm922_vm5, 0, %v921_v48  ;;  %v106_v63 = vadd.s32 %v1168_v3, %v1174_v6  ;;  %v414_v25 = vmul.u32 %v1199_v30, %v398_v43  ;;  %vm416_vm6 = vc.u32 %v1262_v53, %v1248_v32 }
  0xb8   :  { %v336_v57 = vand.u32 2147483647, %v335_v54  ;;  %v122_v1 = vsub.s32 32, %v121_v60  ;;  %v126_v24 = vsub.s32 4294967266, %v121_v60  ;;  %v168_v39 = vsub.s32 32, %v167_v61 }
  0xb9   :  { %vm52_vm7 = vcmp.lt.s32.totalorder %v1088_v9, 0  ;;  %v123_v2 = vshll.u32 %v1218_v0, %v121_v60  ;;  %v418_v7 = vsel %vm416_vm6, %v417_v10, %v1249_v33  ;;  %v136_v3 = vsub.s32 4, %v1208_v50 }
  0xba   :  { %v339_v28 = vmul.f32 %v338_v59, %v336_v57  ;;  %v124_v4 = vshrl.u32 %v106_v63, %v122_v1  ;;  %v127_v5 = vadd.s32 127, %v126_v24  ;;  %v419_v6 = vadd.s32 %v418_v7, %v414_v25 }
  0xbb   :  { %v166_v14 = vshrl.u32 %v165_v56, 5  ;;  %v170_v30 = vshll.u32 %v1041_v41, %v167_v61  ;;  %v171_v19 = vshrl.u32 %v1042_v45, %v168_v39  ;;  %v176_v0 = vshll.u32 %v1043_v47, %v167_v61 }
  0xbc   :  { %v340_v13 = vxor.u32 2147483648, %v339_v28  ;;  %v125_v16 = vor.u32 %v124_v4, %v123_v2  ;;  %v128_v18 = vshll.u32 %v127_v5, 23  ;;  %v420_v21 = vadd.s32 536870912, %v419_v6 }
  0xbd   :  { %v177_v44 = vshrl.u32 %v1044_v49, %v168_v39  ;;  %vm1292_vm8 = vcmp.le.f32.partialorder %v50_v12, 0.7853982  ;;  %v173_v26 = vshll.u32 %v1042_v45, %v167_v61  ;;  %v174_v38 = vshrl.u32 %v1043_v47, %v168_v39 }
  0xbe   :  { %v341_v20 = vsel %vm258_vm13, %v340_v13, %v339_v28  ;;  %v129_v23 = vor.u32 4788187, %v128_v18  ;;  %v132_v29 = vcvt.s32.f32 %v125_v16  ;;  %v1298_v31 = vshrl.u32 %v420_v21, 30 }
  0xbf   :  { %v344_v11 = vsel %vm1256_vm3, %v1086_v8, %v341_v20  ;;  %v178_v33 = vor.u32 %v177_v44, %v176_v0  ;;  %v179_v40 = vshll.u32 %v1044_v49, %v167_v61  ;;  %v180_v42 = vshrl.u32 %v1045_v51, %v168_v39 }
  0xc0   :  { %980 = vcosq.f32 %v344_v11  ;;  %v130_v34 = vand.u32 2147483647, %v129_v23  ;;  %v767_v12 = vadd.s32 3, %v345_v36  ;;  %v422_v22 = vshll.u32 %v1298_v31, 30 }
  0xc1   :  { %982 = vsinq.f32 %v344_v11  ;;  %v172_v46 = vor.u32 %v171_v19, %v170_v30  ;;  %v183_v48 = vshrl.u32 %v1046_v58, %v168_v39  ;;  %v175_v52 = vor.u32 %v174_v38, %v173_v26 }
  0xc2   :  { %v133_v45 = vmul.f32 %v132_v29, %v130_v34  ;;  %v181_v47 = vor.u32 %v180_v42, %v179_v40  ;;  %v182_v54 = vshll.u32 %v1045_v51, %v167_v61  ;;  %v137_v43 = vsel %vm52_vm7, %v136_v3, %v1208_v50 }
  0xc3   :  { %v1308_v10 = vsub.s32 %v419_v6, %v422_v22  ;;  %vm188_vm9 = vcmp.lt.s32.totalorder %v166_v14, 4  ;;  %v201_v49 = vshll.u32 %v161_v55, 8  ;;  %v169_v36 = vshrl.u32 %v1041_v41, %v168_v39 }
  0xc4   :  { %v134_v56 = vxor.u32 2147483648, %v133_v45  ;;  %v184_v57 = vor.u32 %v183_v48, %v182_v54  ;;  %v190_v59 = vsel %vm188_vm9, %v178_v33, 2102212464  ;;  %vm185_vm10 = vcmp.lt.s32.totalorder %v166_v14, 1 }
  0xc5   :  { %v425_v58 = vsub.s32 0, %v1308_v10  ;;  %vm186_vm11 = vcmp.lt.s32.totalorder %v166_v14, 2  ;;  %vm187_vm12 = vcmp.lt.s32.totalorder %v166_v14, 3  ;;  %v189_v60 = vsel %vm185_vm10, %v169_v36, %v172_v46 }
  0xc6   :  { %v135_v51 = vsel %vm52_vm7, %v134_v56, %v133_v45  ;;  %v193_v50 = vsel %vm185_vm10, %v172_v46, %v175_v52  ;;  %v194_v61 = vsel %vm188_vm9, %v181_v47, 920167782  ;;  %v191_v63 = vsel %vm187_vm12, %v175_v52, %v190_v59 }
  0xc7   :  { %v138_v55 = vsel %vm1292_vm8, %v1088_v9, %v135_v51  ;;  %v932_v41 = vmin.u32 %v425_v58, %v1308_v10  ;;  %v195_v1 = vsel %vm187_vm12, %v178_v33, %v194_v61  ;;  %v197_v28 = vsel %vm185_vm10, %v175_v52, %v178_v33 }
  0xc8   :  { %984 = vcosq.f32 %v138_v55  ;;  %v196_v24 = vsel %vm186_vm11, %v193_v50, %v195_v1  ;;  %v198_v25 = vsel %vm188_vm9, %v184_v57, 1326507024  ;;  %v139_v39 = vsel %vm1292_vm8, 0, %v137_v43 }
  0xc9   :  { %986 = vsinq.f32 %v138_v55  ;;  %v427_v2 = vclz %v932_v41  ;;  %v199_v4 = vsel %vm187_vm12, %v181_v47, %v198_v25  ;;  %v192_v5 = vsel %vm186_vm11, %v189_v60, %v191_v63 }
  0xca   :  { %v200_v7 = vsel %vm186_vm11, %v197_v28, %v199_v4  ;;  %v1329_v13 = vmul.u32.u64.low %v201_v49, %v196_v24  ;;  %v1330_v3 = vmul.u32.u64.high %v201_v49, %v196_v24, %v1329_v13  ;;  %v768_v19 = vand.u32 3, %v767_v12 }
  0xcb   :  { %v933_v6 = vadd.s32 4294967294, %v427_v2  ;;  %v1333_v16 = vmul.u32.u64.low %v201_v49, %v200_v7  ;;  %v1334_v18 = vmul.u32.u64.high %v201_v49, %v200_v7, %v1333_v16  ;;  %v1336_v20 = vand.u32 3, %v139_v39 }
  0xcc   :  { %v559_v21 = vadd.s32 3, %v139_v39  ;;  %vm348_vm13 = vweird.f32 %v1086_v8  ;;  %v415_v14 = vadd.s32 %v1248_v32, %v1262_v53  ;;  %v208_v44 = vmul.u32 %v201_v49, %v192_v5 }
  0xcd   :  { %v981_v30 = vpop.eup %980  ;;  %vm934_vm14 = vcmp.lt.s32.totalorder %v933_v6, 0  ;;  %v211_v23 = vadd.s32 1, %v1330_v3  ;;  %vm350_vm15 = vcmp.lt.s32.totalorder %v1270_v62, 2  ;;  %vm351_vm0 = vcmp.eq.s32.totalorder %v1270_v62, 0 }
  0xce   :  { %v983_v0 = vpop.eup %982  ;;  %v355_v11 = vxor.u32 2147483648, %v981_v30  ;;  %v430_v37 = vsel %vm934_vm14, 0, %v933_v6  ;;  %vm354_vm1 = vcmp.eq.s32.totalorder %v1270_v62, 2  ;;  %vm210_vm2 = vc.u32 %v1334_v18, %v1329_v13 }
  0xcf   :  { %v352_v26 = vxor.u32 2147483648, %v983_v0  ;;  %v431_v38 = vsub.s32 32, %v430_v37  ;;  %v435_v29 = vsub.s32 4294967266, %v430_v37  ;;  %v432_v33 = vshll.u32 %v1308_v10, %v430_v37 }
  0xd0   :  { %v356_v53 = vsel %vm354_vm1, %v355_v11, %v983_v0  ;;  %v212_v42 = vsel %vm210_vm2, %v211_v23, %v1330_v3  ;;  %v560_v22 = vand.u32 3, %v559_v21  ;;  %vm770_vm3 = vcmp.eq.s32.totalorder %v768_v19, 0 }
  0xd1   :  { %v353_v32 = vsel %vm351_vm0, %v981_v30, %v352_v26  ;;  %v433_v34 = vshrl.u32 %v415_v14, %v431_v38  ;;  %v436_v40 = vadd.s32 127, %v435_v29  ;;  %v213_v46 = vadd.s32 %v212_v42, %v208_v44 }
  0xd2   :  { %v357_v12 = vsel %vm350_vm15, %v353_v32, %v356_v53  ;;  %v772_v52 = vsel %vm770_vm3, %v981_v30, %v352_v26  ;;  %vm773_vm4 = vcmp.eq.s32.totalorder %v768_v19, 2  ;;  %vm769_vm5 = vcmp.lt.s32.totalorder %v768_v19, 2 }
  0xd3   :  { %v358_v48 = vsel %vm348_vm13, nan, %v357_v12  ;;  %v434_v45 = vor.u32 %v433_v34, %v432_v33  ;;  %v437_v62 = vshll.u32 %v436_v40, 23  ;;  %v214_v47 = vadd.s32 536870912, %v213_v46 }
  0xd4   :  { %464 = vst [vmem:[#allocation2 + $0x10] sm:$0xff] %v358_v48  ;;  %v775_v54 = vsel %vm773_vm4, %v355_v11, %v983_v0  ;;  %vm144_vm6 = vcmp.lt.s32.totalorder %v1336_v20, 2  ;;  %vm145_vm7 = vcmp.eq.s32.totalorder %v1336_v20, 0  ;;  %vm148_vm8 = vcmp.eq.s32.totalorder %v1336_v20, 2 }
  0xd5   :  { %v985_v43 = vpop.eup %984  ;;  %v438_v10 = vor.u32 4788187, %v437_v62  ;;  %v776_v49 = vsel %vm769_vm5, %v772_v52, %v775_v54  ;;  %v1353_v36 = vshrl.u32 %v214_v47, 30  ;;  %v441_v51 = vcvt.s32.f32 %v434_v45 }
  0xd6   :  { %v987_v56 = vpop.eup %986  ;;  %v149_v57 = vxor.u32 2147483648, %v985_v43  ;;  %v777_v59 = vsel %vm348_vm13, nan, %v776_v49  ;;  %vm565_vm9 = vcmp.eq.s32.totalorder %v560_v22, 2  ;;  %vm562_vm10 = vcmp.eq.s32.totalorder %v560_v22, 0 }
  0xd7   :  { %v439_v58 = vand.u32 2147483647, %v438_v10  ;;  %v146_v60 = vxor.u32 2147483648, %v987_v56  ;;  %884 = vst [vmem:[#allocation4 + $0x10] sm:$0xff] %v777_v59  ;;  %v216_v50 = vshll.u32 %v1353_v36, 30  ;;  %vm561_vm11 = vcmp.lt.s32.totalorder %v560_v22, 2 }
  0xd8   :  { %v150_v61 = vsel %vm148_vm8, %v149_v57, %v987_v56  ;;  %v567_v55 = vsel %vm565_vm9, %v149_v57, %v987_v56  ;;  %vm142_vm12 = vweird.f32 %v1088_v9  ;;  %vm361_vm13 = vcmp.lt.s32.totalorder %v1096_v17, 0 }
  0xd9   :  { %v442_v41 = vmul.f32 %v441_v51, %v439_v58  ;;  %v147_v63 = vsel %vm145_vm7, %v985_v43, %v146_v60  ;;  %v564_v1 = vsel %vm562_vm10, %v985_v43, %v146_v60  ;;  %v217_v24 = vsub.s32 %v213_v46, %v216_v50 }
  0xda   :  { %v151_v8 = vsel %vm144_vm6, %v147_v63, %v150_v61  ;;  %v568_v28 = vsel %vm561_vm11, %v564_v1, %v567_v55  ;;  %v445_v4 = vsub.s32 4, %v1298_v31  ;;  %vm360_vm14 = vcmp.le.f32.partialorder %v359_v27, 0.7853982 }
  0xdb   :  { %v443_v25 = vxor.u32 2147483648, %v442_v41  ;;  %v152_v39 = vsel %vm142_vm12, nan, %v151_v8  ;;  %v569_v2 = vsel %vm142_vm12, nan, %v568_v28  ;;  %v219_v5 = vsub.s32 0, %v217_v24 }
  0xdc   :  { %462 = vst [vmem:[#allocation2] sm:$0xff] %v152_v39  ;;  %882 = vst [vmem:[#allocation4] sm:$0xff] %v569_v2  ;;  %v446_v6 = vsel %vm361_vm13, %v445_v4, %v1298_v31  ;;  %v209_v0 = vadd.s32 %v1329_v13, %v1334_v18  ;;  %vm451_vm6 = vweird.f32 %v1096_v17  ;;  %vm155_vm7 = vcmp.lt.s32.totalorder %v1102_v35, 0 }
  0xdd   :  { %v444_v7 = vsel %vm361_vm13, %v443_v25, %v442_v41  ;;  %v924_v3 = vmin.u32 %v219_v5, %v217_v24  ;;  %v448_v19 = vsel %vm360_vm14, 0, %v446_v6  ;;  %v239_v54 = vsub.s32 4, %v1353_v36 }
  0xde   :  { %v447_v9 = vsel %vm360_vm14, %v1096_v17, %v444_v7  ;;  %v871_v21 = vadd.s32 3, %v448_v19  ;;  %v452_v23 = vand.u32 3, %v448_v19  ;;  %vm154_vm8 = vcmp.le.f32.partialorder %v153_v15, 0.7853982 }
  0xdf   :  { %988 = vcosq.f32 %v447_v9  ;;  %v221_v16 = vclz %v924_v3  ;;  %v240_v17 = vsel %vm155_vm7, %v239_v54, %v1353_v36 }
  0xe0   :  { %990 = vsinq.f32 %v447_v9  ;;  %v872_v26 = vand.u32 3, %v871_v21  ;;  %vm453_vm0 = vcmp.lt.s32.totalorder %v452_v23, 2  ;;  %vm457_vm1 = vcmp.eq.s32.totalorder %v452_v23, 2 }
  0xe1   :  { %v925_v30 = vadd.s32 4294967294, %v221_v16  ;;  %vm454_vm3 = vcmp.eq.s32.totalorder %v452_v23, 0  ;;  %v242_v49 = vsel %vm154_vm8, 0, %v240_v17 }
  0xe2   :  { %vm877_vm2 = vcmp.eq.s32.totalorder %v872_v26, 2  ;;  %vm874_vm4 = vcmp.eq.s32.totalorder %v872_v26, 0  ;;  %vm873_vm5 = vcmp.lt.s32.totalorder %v872_v26, 2  ;;  %v663_v56 = vadd.s32 3, %v242_v49 }
  0xe3   :  { %vm926_vm15 = vcmp.lt.s32.totalorder %v925_v30, 0  ;;  %v246_v57 = vand.u32 3, %v242_v49 }
  0xe4   :  { %v224_v20 = vsel %vm926_vm15, 0, %v925_v30  ;;  %v664_v59 = vand.u32 3, %v663_v56  ;;  %vm245_vm15 = vweird.f32 %v1102_v35 }
  0xe5   :  { %v225_v14 = vsub.s32 32, %v224_v20  ;;  %v229_v44 = vsub.s32 4294967266, %v224_v20  ;;  %v226_v27 = vshll.u32 %v217_v24, %v224_v20  ;;  %vm251_vm9 = vcmp.eq.s32.totalorder %v246_v57, 2 }
  0xe6   :  { %vm669_vm10 = vcmp.eq.s32.totalorder %v664_v59, 2  ;;  %vm248_vm11 = vcmp.eq.s32.totalorder %v246_v57, 0  ;;  %vm666_vm12 = vcmp.eq.s32.totalorder %v664_v59, 0  ;;  %vm247_vm13 = vcmp.lt.s32.totalorder %v246_v57, 2 }
  0xe7   :  { %v227_v11 = vshrl.u32 %v209_v0, %v225_v14  ;;  %v230_v37 = vadd.s32 127, %v229_v44  ;;  %vm665_vm14 = vcmp.lt.s32.totalorder %v664_v59, 2 }
  0xe9   :  { %v228_v38 = vor.u32 %v227_v11, %v226_v27  ;;  %v231_v29 = vshll.u32 %v230_v37, 23 }
  0xeb   :  { %v232_v33 = vor.u32 4788187, %v231_v29  ;;  %v235_v40 = vcvt.s32.f32 %v228_v38 }
  0xec   :  { %v989_v31 = vpop.eup %988 }
  0xed   :  { %v991_v32 = vpop.eup %990  ;;  %v458_v53 = vxor.u32 2147483648, %v989_v31  ;;  %v233_v34 = vand.u32 2147483647, %v232_v33 }
  0xee   :  { %v455_v42 = vxor.u32 2147483648, %v991_v32 }
  0xef   :  { %v459_v13 = vsel %vm457_vm1, %v458_v53, %v991_v32  ;;  %v879_v18 = vsel %vm877_vm2, %v458_v53, %v991_v32  ;;  %v236_v12 = vmul.f32 %v235_v40, %v233_v34 }
  0xf0   :  { %v456_v22 = vsel %vm454_vm3, %v989_v31, %v455_v42  ;;  %v876_v46 = vsel %vm874_vm4, %v989_v31, %v455_v42 }
  0xf1   :  { %v460_v48 = vsel %vm453_vm0, %v456_v22, %v459_v13  ;;  %v880_v45 = vsel %vm873_vm5, %v876_v46, %v879_v18  ;;  %v237_v62 = vxor.u32 2147483648, %v236_v12 }
  0xf2   :  { %v461_v52 = vsel %vm451_vm6, nan, %v460_v48  ;;  %v881_v47 = vsel %vm451_vm6, nan, %v880_v45 }
  0xf3   :  { %465 = vst [vmem:[#allocation2 + $0x18] sm:$0xff] %v461_v52  ;;  %885 = vst [vmem:[#allocation4 + $0x18] sm:$0xff] %v881_v47  ;;  %v238_v43 = vsel %vm155_vm7, %v237_v62, %v236_v12 }
  0xf4   :  { %v241_v10 = vsel %vm154_vm8, %v1102_v35, %v238_v43 }
  0xf5   :  { %992 = vcosq.f32 %v241_v10 }
  0xf6   :  { %994 = vsinq.f32 %v241_v10 }
 0x102   :  { %v993_v58 = vpop.eup %992 }
 0x103   :  { %v995_v51 = vpop.eup %994  ;;  %v252_v60 = vxor.u32 2147483648, %v993_v58 }
 0x104   :  { %v249_v50 = vxor.u32 2147483648, %v995_v51 }
 0x105   :  { %v253_v15 = vsel %vm251_vm9, %v252_v60, %v995_v51  ;;  %v671_v61 = vsel %vm669_vm10, %v252_v60, %v995_v51 }
 0x106   :  { %v250_v36 = vsel %vm248_vm11, %v993_v58, %v249_v50  ;;  %v668_v55 = vsel %vm666_vm12, %v993_v58, %v249_v50 }
 0x107   :  { %v254_v41 = vsel %vm247_vm13, %v250_v36, %v253_v15  ;;  %v672_v63 = vsel %vm665_vm14, %v668_v55, %v671_v61 }
 0x108   :  { %v255_v1 = vsel %vm245_vm15, nan, %v254_v41  ;;  %v673_v24 = vsel %vm245_vm15, nan, %v672_v63 }
 0x109   :  { %463 = vst [vmem:[#allocation2 + $0x8] sm:$0xff] %v255_v1  ;;  %883 = vst [vmem:[#allocation4 + $0x8] sm:$0xff] %v673_v24 }
 0x10a   :  { %1007 = shalt.err (!%p1004_p4)
}
 0x10b   :  { %s1049_s25 = smov 128   ;;  %s1050_s26 = smov 8  }
 0x10c   :  { %897 = dma.vmem_to_hbm [thread:$0]  %s892_s1, 512, %s1389_s2, [#allocation3], %s1049_s25, %s1049_s25, %s1050_s26  }
 0x10d   :  { %s1016_s29 = scalar_lea.vmem %s904_s23, 512  ;;  %p1021_p6 = scmp.lt.s32.totalorder %s904_s23, %s904_s23 }
 0x10e   :  { %p1017_p5 = scmp.ne.s32.totalorder %s904_s23, %s1016_s29  ;;  %p1022_p7 = scmp.lt.s32.totalorder %s1016_s29, %s1016_s29 }
 0x110   :  { %p1023_p8 = por %p1022_p7, %p1021_p6 }
 0x112   :  { %p1024_p9 = pnand %p1023_p8, %p1017_p5 }
 0x114   :  { %1027 = shalt.err (!%p1024_p9)
}
 0x115   :  { %909 = dma.vmem_to_hbm [thread:$0]  %s904_s23, 512, %s1390_s3, [#allocation5], %s1049_s25, %s1049_s25, %s1050_s26  }
 0x116   :  { %1036 = dma.done.wait [#allocation3], 512  }
 0x117   :  { %1037 = vsyncadd [#allocation3], 4294966784 }
 0x118   :  { %1038 = dma.done.wait [#allocation5], 512  }
 0x119   :  { %1039 = vsyncadd [#allocation5], 4294966784 }
 0x11a   :  { %916 = vsyncpa [#allocation3], 1 }
 0x11b   :  { %917 = vsyncpa [#allocation5], 1 }

</bundles_post_ra>
